<compile_context>
chip_gen: v6e
topology: v6e:2x2x1
jax: 0.10.0
libtpu: 0.0.40
codegen_flags: <defaults>
</compile_context>

<pallas_src>
import jax
import jax.numpy as jnp
from jax.experimental import pallas as pl
from jax.experimental.pallas import tpu as pltpu


def _round_up(x, m):
    return ((x + m - 1) // m) * m


def _mlp3_kernel(x_ref, w1_ref, w2_ref, b2_ref, w3_ref, b3_ref, o_ref):
    # x: (TB, 8) bf16   [obs | unc | 1 | 0]
    # w1: (8, H) bf16   rows 0-5 = W1, row 6 = b1, row 7 = 0
    # w2, w3: (H, H) bf16 ; b2, b3: (1, H) f32 ; o: (TB, H)
    h = jnp.dot(x_ref[...], w1_ref[...], preferred_element_type=jnp.float32)
    h = jnp.maximum(h, 0.0)
    h = jnp.dot(h.astype(jnp.bfloat16), w2_ref[...],
                preferred_element_type=jnp.float32) + b2_ref[...]
    h = jnp.maximum(h, 0.0)
    h = jnp.dot(h.astype(jnp.bfloat16), w3_ref[...],
                preferred_element_type=jnp.float32) + b3_ref[...]
    h = jnp.maximum(h, 0.0)
    o_ref[...] = h.astype(o_ref.dtype)


def conditioning_net_pallas(observed_data, uncertainties, params, *,
                            tile_b=None, out_dtype=jnp.float32):
    """3-layer MLP (Linear->ReLU x3); concat + layer-1 bias fused into one matmul.

    observed_data, uncertainties: (B, 3) float arrays.
    params: dict with w1 (6,H), b1 (1,H), w2 (H,H), b2 (1,H), w3 (H,H), b3 (1,H)
            (weights stored (in_features, out_features), i.e. transpose of nn.Linear).
    tile_b: batch tile (multiple of 8).  Auto: >=2 grid steps when possible,
            capped at 2048.
    out_dtype: output dtype (f32 default; bf16 halves output HBM traffic).
    """
    B, f_obs = observed_data.shape
    assert f_obs == 3 and uncertainties.shape == (B, 3)
    H = params["w1"].shape[1]

    if tile_b is None:
        # At least 2 grid steps when the batch permits (v7x has 2 TensorCores);
        # cap at 2048 rows (a few MiB of live VMEM, safe on every generation
        # with the raised scoped-VMEM limit below).
        tile_b = max(8, min(2048, _round_up(-(-B // 2), 8)))
    assert tile_b % 8 == 0

    # Packed input [obs | unc | 1 | 0]: the concat and the layer-1 bias column
    # are fused so the kernel's first layer is a single (TB,8)@(8,H) dot.
    x = jnp.concatenate(
        [observed_data.astype(jnp.float32),
         uncertainties.astype(jnp.float32),
         jnp.ones((B, 1), jnp.float32),
         jnp.zeros((B, 1), jnp.float32)],
        axis=1,
    ).astype(jnp.bfloat16)

    # Packed layer-1 weight: rows 0-5 = w1, row 6 = b1, row 7 = 0.
    w1p = jnp.concatenate(
        [params["w1"].astype(jnp.float32),
         params["b1"].reshape(1, H).astype(jnp.float32),
         jnp.zeros((1, H), jnp.float32)],
        axis=0,
    ).astype(jnp.bfloat16)

    w2 = params["w2"].astype(jnp.bfloat16)
    w3 = params["w3"].astype(jnp.bfloat16)
    b2 = params["b2"].reshape(1, H).astype(jnp.float32)
    b3 = params["b3"].reshape(1, H).astype(jnp.float32)

    grid = (pl.cdiv(B, tile_b),)  # ragged edge: Pallas masks OOB writeback rows.

    # Grid-invariant full-array blocks: parameters stay resident in VMEM and
    # their DMAs are not re-issued per grid step.
    inv = lambda shape: pl.BlockSpec(shape, lambda i: (0, 0))

    return pl.pallas_call(
        _mlp3_kernel,
        out_shape=jax.ShapeDtypeStruct((B, H), out_dtype),
        grid_spec=pltpu.PrefetchScalarGridSpec(
            num_scalar_prefetch=0,
            grid=grid,
            in_specs=[
                pl.BlockSpec((tile_b, 8), lambda i: (i, 0)),  # packed input tile
                inv((8, H)),   # w1 (+ bias row)
                inv((H, H)),   # w2
                inv((1, H)),   # b2
                inv((H, H)),   # w3
                inv((1, H)),   # b3
            ],
            out_specs=pl.BlockSpec((tile_b, H), lambda i: (i, 0)),
        ),
        compiler_params=pltpu.CompilerParams(
            dimension_semantics=("parallel",),
            vmem_limit_bytes=32 * 1024 * 1024,
        ),
    )(x, w1p, w2, b2, w3, b3)


def enhanced_recognition_forward(observed_data, uncertainties, params, *,
                                 tile_b=None, out_dtype=jnp.float32):
    """Equivalent of EnhancedRecognitionNetwork3D.forward."""
    return conditioning_net_pallas(observed_data, uncertainties, params,
                                   tile_b=tile_b, out_dtype=out_dtype)


def init_params(key, hidden_dim=128, in_dim=6):
    """Deterministic init mimicking nn.Linear (uniform in +-1/sqrt(fan_in))."""
    ks = jax.random.split(key, 6)

    def lin(kw, kb, fan_in, fan_out):
        bound = 1.0 / jnp.sqrt(float(fan_in))
        w = jax.random.uniform(kw, (fan_in, fan_out), jnp.float32, -bound, bound)
        b = jax.random.uniform(kb, (1, fan_out), jnp.float32, -bound, bound)
        return w, b

    w1, b1 = lin(ks[0], ks[1], in_dim, hidden_dim)
    w2, b2 = lin(ks[2], ks[3], hidden_dim, hidden_dim)
    w3, b3 = lin(ks[4], ks[5], hidden_dim, hidden_dim)
    return {"w1": w1, "b1": b1, "w2": w2, "b2": b2, "w3": w3, "b3": b3}


# TODO(synk): sample()/log_prob() rely on nflows' masked piecewise rational
# quadratic autoregressive transforms + StandardNormal base distribution; only
# forward() (the conditioning net) is implemented as a Pallas kernel here.


def _reference_forward(observed_data, uncertainties, params):
    x = jnp.concatenate([observed_data, uncertainties], axis=1).astype(jnp.float32)
    h = jnp.maximum(x @ params["w1"] + params["b1"], 0.0)
    h = jnp.maximum(h @ params["w2"] + params["b2"], 0.0)
    h = jnp.maximum(h @ params["w3"] + params["b3"], 0.0)
    return h


if __name__ == "__main__":
    key = jax.random.PRNGKey(0)
    k_param, k_obs, k_unc = jax.random.split(key, 3)

    hidden_dim = 128  # module default
    params = init_params(k_param, hidden_dim=hidden_dim, in_dim=6)

    # bf16 matmul operands => relaxed tolerance vs the f32 reference.
    ATOL, RTOL = 7.5e-2, 5e-2

    # Small, module-consistent shapes: (batch, 3) observations + uncertainties.
    batch = 8
    observed_data = jax.random.normal(k_obs, (batch, 3), jnp.float32)
    uncertainties = jnp.abs(jax.random.normal(k_unc, (batch, 3), jnp.float32))

    out = jax.block_until_ready(
        enhanced_recognition_forward(observed_data, uncertainties, params))
    ref = _reference_forward(observed_data, uncertainties, params)
    assert out.shape == (batch, hidden_dim) and out.dtype == jnp.float32
    assert jnp.allclose(out, ref, atol=ATOL, rtol=RTOL), "mismatch vs reference"

    # Ragged batch path (B not a multiple of tile_b; Pallas masks the edge block).
    batch2 = 20
    obs2 = jax.random.normal(jax.random.PRNGKey(1), (batch2, 3), jnp.float32)
    unc2 = jnp.abs(jax.random.normal(jax.random.PRNGKey(2), (batch2, 3), jnp.float32))
    out2 = jax.block_until_ready(
        enhanced_recognition_forward(obs2, unc2, params))
    ref2 = _reference_forward(obs2, unc2, params)
    assert out2.shape == (batch2, hidden_dim)
    assert jnp.allclose(out2, ref2, atol=ATOL, rtol=RTOL), "mismatch (ragged batch)"

    # Optional bf16-output path (halves output HBM writeback).
    out3 = jax.block_until_ready(
        enhanced_recognition_forward(observed_data, uncertainties, params,
                                     out_dtype=jnp.bfloat16))
    assert out3.dtype == jnp.bfloat16
    assert jnp.allclose(out3.astype(jnp.float32), ref, atol=1e-1, rtol=1e-1), \
        "mismatch (bf16 output)"

    print("KERNEL_OK")
</pallas_src>

<mosaic_0001>
module attributes {stable_mosaic.version = 11 : i64} {
  func.func @_mlp3_kernel(%arg0: i32, %arg1: memref<8x8xbf16, #tpu.memory_space<vmem>>, %arg2: memref<8x128xbf16, #tpu.memory_space<vmem>>, %arg3: memref<128x128xbf16, #tpu.memory_space<vmem>>, %arg4: memref<1x128xf32, #tpu.memory_space<vmem>>, %arg5: memref<128x128xbf16, #tpu.memory_space<vmem>>, %arg6: memref<1x128xf32, #tpu.memory_space<vmem>>, %arg7: memref<8x128xf32, #tpu.memory_space<vmem>>) attributes {dimension_semantics = [#tpu.dimension_semantics<parallel>], iteration_bounds = array<i64: 1>, scalar_prefetch = 0 : i64, scratch_operands = 0 : i64, tpu.core_type = #tpu.core_type<tc>, window_params = [{transform_indices = @transform_0, window_bounds = array<i64: 8, 8>}, {pipeline_mode = #tpu.pipeline_mode<synchronous>, transform_indices = @transform_1, window_bounds = array<i64: 8, 128>}, {pipeline_mode = #tpu.pipeline_mode<synchronous>, transform_indices = @transform_2, window_bounds = array<i64: 128, 128>}, {pipeline_mode = #tpu.pipeline_mode<synchronous>, transform_indices = @transform_3, window_bounds = array<i64: 1, 128>}, {pipeline_mode = #tpu.pipeline_mode<synchronous>, transform_indices = @transform_4, window_bounds = array<i64: 128, 128>}, {pipeline_mode = #tpu.pipeline_mode<synchronous>, transform_indices = @transform_5, window_bounds = array<i64: 1, 128>}, {transform_indices = @transform_6, window_bounds = array<i64: 8, 128>}]} {
    %c0 = arith.constant 0 : index
    %c0_0 = arith.constant 0 : index
    %0 = vector.load %arg1[%c0, %c0_0] : memref<8x8xbf16, #tpu.memory_space<vmem>>, vector<8x8xbf16>
    %c0_1 = arith.constant 0 : index
    %c0_2 = arith.constant 0 : index
    %1 = vector.load %arg2[%c0_1, %c0_2] : memref<8x128xbf16, #tpu.memory_space<vmem>>, vector<8x128xbf16>
    %cst = arith.constant dense<0.000000e+00> : vector<8x128xf32>
    %2 = tpu.matmul %0, %1, %cst {dimension_numbers = #tpu.dot_dimension_numbers<[1], [0], [0], [1], [0, 0, 1, 1], [], []>} : vector<8x8xbf16>, vector<8x128xbf16>, vector<8x128xf32> -> vector<8x128xf32>
    %cst_3 = arith.constant 0.000000e+00 : f32
    %3 = vector.broadcast %cst_3 : f32 to vector<8x128xf32>
    %4 = arith.maximumf %2, %3 : vector<8x128xf32>
    %5 = arith.truncf %4 : vector<8x128xf32> to vector<8x128xbf16>
    %c0_4 = arith.constant 0 : index
    %c0_5 = arith.constant 0 : index
    %6 = vector.load %arg3[%c0_4, %c0_5] : memref<128x128xbf16, #tpu.memory_space<vmem>>, vector<128x128xbf16>
    %cst_6 = arith.constant dense<0.000000e+00> : vector<8x128xf32>
    %7 = tpu.matmul %5, %6, %cst_6 {dimension_numbers = #tpu.dot_dimension_numbers<[1], [0], [0], [1], [0, 0, 1, 1], [], []>} : vector<8x128xbf16>, vector<128x128xbf16>, vector<8x128xf32> -> vector<8x128xf32>
    %c0_7 = arith.constant 0 : index
    %c0_8 = arith.constant 0 : index
    %8 = vector.load %arg4[%c0_7, %c0_8] : memref<1x128xf32, #tpu.memory_space<vmem>>, vector<1x128xf32>
    %9 = vector.broadcast %8 : vector<1x128xf32> to vector<8x128xf32>
    %10 = arith.addf %7, %9 : vector<8x128xf32>
    %cst_9 = arith.constant 0.000000e+00 : f32
    %11 = vector.broadcast %cst_9 : f32 to vector<8x128xf32>
    %12 = arith.maximumf %10, %11 : vector<8x128xf32>
    %13 = arith.truncf %12 : vector<8x128xf32> to vector<8x128xbf16>
    %c0_10 = arith.constant 0 : index
    %c0_11 = arith.constant 0 : index
    %14 = vector.load %arg5[%c0_10, %c0_11] : memref<128x128xbf16, #tpu.memory_space<vmem>>, vector<128x128xbf16>
    %cst_12 = arith.constant dense<0.000000e+00> : vector<8x128xf32>
    %15 = tpu.matmul %13, %14, %cst_12 {dimension_numbers = #tpu.dot_dimension_numbers<[1], [0], [0], [1], [0, 0, 1, 1], [], []>} : vector<8x128xbf16>, vector<128x128xbf16>, vector<8x128xf32> -> vector<8x128xf32>
    %c0_13 = arith.constant 0 : index
    %c0_14 = arith.constant 0 : index
    %16 = vector.load %arg6[%c0_13, %c0_14] : memref<1x128xf32, #tpu.memory_space<vmem>>, vector<1x128xf32>
    %17 = vector.broadcast %16 : vector<1x128xf32> to vector<8x128xf32>
    %18 = arith.addf %15, %17 : vector<8x128xf32>
    %cst_15 = arith.constant 0.000000e+00 : f32
    %19 = vector.broadcast %cst_15 : f32 to vector<8x128xf32>
    %20 = arith.maximumf %18, %19 : vector<8x128xf32>
    %c0_16 = arith.constant 0 : index
    %c0_17 = arith.constant 0 : index
    %21 = vector.load %arg7[%c0_16, %c0_17] : memref<8x128xf32, #tpu.memory_space<vmem>>, vector<8x128xf32>
    tpu.vector_store %arg7[%c0_16, %c0_17], %20 {strides = array<i32>} : memref<8x128xf32, #tpu.memory_space<vmem>>, vector<8x128xf32>,
    return
  }
  func.func @transform_0(%arg0: i32) -> (i32, i32) {
    %c0_i32 = arith.constant 0 : i32
    %c0_i32_0 = arith.constant 0 : i32
    return %arg0, %c0_i32 : i32, i32
  }
  func.func @transform_1(%arg0: i32) -> (i32, i32) {
    %c0_i32 = arith.constant 0 : i32
    %c0_i32_0 = arith.constant 0 : i32
    %c0_i32_1 = arith.constant 0 : i32
    return %c0_i32, %c0_i32_0 : i32, i32
  }
  func.func @transform_2(%arg0: i32) -> (i32, i32) {
    %c0_i32 = arith.constant 0 : i32
    %c0_i32_0 = arith.constant 0 : i32
    %c0_i32_1 = arith.constant 0 : i32
    return %c0_i32, %c0_i32_0 : i32, i32
  }
  func.func @transform_3(%arg0: i32) -> (i32, i32) {
    %c0_i32 = arith.constant 0 : i32
    %c0_i32_0 = arith.constant 0 : i32
    %c0_i32_1 = arith.constant 0 : i32
    return %c0_i32, %c0_i32_0 : i32, i32
  }
  func.func @transform_4(%arg0: i32) -> (i32, i32) {
    %c0_i32 = arith.constant 0 : i32
    %c0_i32_0 = arith.constant 0 : i32
    %c0_i32_1 = arith.constant 0 : i32
    return %c0_i32, %c0_i32_0 : i32, i32
  }
  func.func @transform_5(%arg0: i32) -> (i32, i32) {
    %c0_i32 = arith.constant 0 : i32
    %c0_i32_0 = arith.constant 0 : i32
    %c0_i32_1 = arith.constant 0 : i32
    return %c0_i32, %c0_i32_0 : i32, i32
  }
  func.func @transform_6(%arg0: i32) -> (i32, i32) {
    %c0_i32 = arith.constant 0 : i32
    %c0_i32_0 = arith.constant 0 : i32
    return %arg0, %c0_i32 : i32, i32
  }
}

</mosaic_0001>

<bundles_post_ra>
// kernel: tpu_custom_call.1
= control target key start
LH: loop header
LB: loop body
LE: loop exit
PB: predicated region body
PF: predicated region fallthrough
CT: control target
= control target key end

     0   :  { %11 = vsyncpa [#allocation3], 0  ;;  %s677_s0 = inlined_call_operand.hbm [shape: bf16[8,8], index: 0, kind: input, shape index: {}]   ;;  %s678_s1 = inlined_call_operand.hbm [shape: bf16[8,128], index: 1, kind: input, shape index: {}]   ;;  %s679_s2 = inlined_call_operand.hbm [shape: bf16[128,128], index: 2, kind: input, shape index: {}]   ;;  %s680_s3 = inlined_call_operand.vmem [shape: f32[1,128], index: 3, kind: input, shape index: {}]   ;;  %s681_s4 = inlined_call_operand.hbm [shape: bf16[128,128], index: 4, kind: input, shape index: {}]   ;;  %s682_s5 = inlined_call_operand.vmem [shape: f32[1,128], index: 5, kind: input, shape index: {}]   ;;  %s683_s6 = inlined_call_operand.hbm [shape: f32[8,128], index: 6, kind: output, shape index: {}]  }
   0x1   :  { %12 = vsyncpa [#allocation6], 0 }
   0x2   :  { %13 = vsyncpa [#allocation9], 0 }
   0x3   :  { %14 = vsyncpa [#allocation4], 0  ;;  %s589_s21 = smov [#allocation5]   ;;  %s590_s23 = smov [#allocation2]  }
   0x4   :  { %s31_s22 = sshll.u32 %s589_s21, 4  ;;  %s21_s24 = sshll.u32 %s590_s23, 4  ;;  %s32_s22 = int_to_ptr.vmem [resolvable:$true] %s31_s22  ;;  %s22_s24 = int_to_ptr.vmem [resolvable:$true] %s21_s24 }
   0x5   :  { %s489_s25 = scalar_lea.vmem %s32_s22, 64  ;;  %p494_p1 = scmp.lt.s32.totalorder %s32_s22, %s32_s22 }
   0x6   :  { %p490_p0 = scmp.ne.s32.totalorder %s32_s22, %s489_s25  ;;  %p495_p2 = scmp.lt.s32.totalorder %s489_s25, %s489_s25 }
   0x8   :  { %p496_p3 = por %p495_p2, %p494_p1 }
   0xa   :  { %p497_p4 = pnand %p496_p3, %p490_p0 }
   0xc   :  { %500 = shalt.err (!%p497_p4)
}
   0xd   :  { %34 = dma.hbm_to_vmem [thread:$0]  %s678_s1, 64, %s32_s22, [#allocation6]  }
   0xe   :  { %s509_s28 = scalar_lea.vmem %s22_s24, 64  ;;  %p514_p6 = scmp.lt.s32.totalorder %s22_s24, %s22_s24 }
   0xf   :  { %p510_p5 = scmp.ne.s32.totalorder %s22_s24, %s509_s28  ;;  %p515_p7 = scmp.lt.s32.totalorder %s509_s28, %s509_s28 }
  0x11   :  { %p516_p8 = por %p515_p7, %p514_p6 }
  0x13   :  { %p517_p9 = pnand %p516_p8, %p510_p5 }
  0x15   :  { %520 = shalt.err (!%p517_p9)
}
  0x16   :  { %24 = dma.hbm_to_vmem [thread:$0]  %s677_s0, 64, %s22_s24, [#allocation3]  }
  0x17   :  { %s591_s7 = smov [#allocation7]  }
  0x18   :  { %s40_s8 = sshll.u32 %s591_s7, 4  ;;  %s41_s8 = int_to_ptr.vmem [resolvable:$true] %s40_s8 }
  0x19   :  { %s529_s9 = scalar_lea.vmem %s41_s8, 1024  ;;  %p534_p11 = scmp.lt.s32.totalorder %s41_s8, %s41_s8 }
  0x1a   :  { %p530_p10 = scmp.ne.s32.totalorder %s41_s8, %s529_s9  ;;  %p535_p12 = scmp.lt.s32.totalorder %s529_s9, %s529_s9 }
  0x1c   :  { %p536_p13 = por %p535_p12, %p534_p11 }
  0x1e   :  { %p537_p0 = pnand %p536_p13, %p530_p10 }
  0x20   :  { %540 = shalt.err (!%p537_p0)
}
  0x21   :  { %s592_s1 = smov 64   ;;  %s593_s10 = smov 4  }
  0x22   :  { %46 = dma.hbm_to_vmem [thread:$0]  %s679_s2, 1024, %s41_s8, [#allocation6], %s592_s1, %s592_s1, %s593_s10  }
  0x23   :  { %s594_s13 = smov [#allocation8]  }
  0x24   :  { %s54_s14 = sshll.u32 %s594_s13, 4  ;;  %s55_s14 = int_to_ptr.vmem [resolvable:$true] %s54_s14 }
  0x25   :  { %s549_s0 = scalar_lea.vmem %s55_s14, 1024  ;;  %p554_p2 = scmp.lt.s32.totalorder %s55_s14, %s55_s14 }
  0x26   :  { %p550_p1 = scmp.ne.s32.totalorder %s55_s14, %s549_s0  ;;  %p555_p3 = scmp.lt.s32.totalorder %s549_s0, %s549_s0 }
  0x28   :  { %p556_p4 = por %p555_p3, %p554_p2 }
  0x2a   :  { %p557_p5 = pnand %p556_p4, %p550_p1 }
  0x2c   :  { %560 = shalt.err (!%p557_p5)
}
  0x2d   :  { %60 = dma.hbm_to_vmem [thread:$0]  %s681_s4, 1024, %s55_s14, [#allocation9], %s592_s1, %s592_s1, %s593_s10  }
  0x2e   :  { %581 = dma.done.wait [#allocation3], 64  }
  0x2f   :  { %582 = vsyncadd [#allocation3], 4294967232 }
  0x30   :  { %583 = dma.done.wait [#allocation6], 1088  }
  0x31   :  { %584 = vsyncadd [#allocation6], 4294966208 }
  0x32   :  { %585 = dma.done.wait [#allocation9], 1024  }
  0x33   :  { %586 = vsyncadd [#allocation9], 4294966272  ;;  %v595_v0 = vmov 0.0   ;;  %vm596_vm0 = vmmov 0   ;;  %vm82_vm1 = vcmask 1043456   ;;  %vm78_vm2 = vcmask 64512  }
  0x34   :  { %410 = vmatprep.subr.bf16.mxu0 %v595_v0  ;;  %412 = vmatprep.mubr.msk.bf16.mxu0 %vm596_vm0, %v595_v0  ;;  %v77_v1 = vld [vmem:[#allocation5] sm:$0xf]  ;;  %v76_v4 = vld [vmem:[#allocation2] sm:$0xf]  ;;  %v466_v5 = vld [vmem:[#allocation7 + $0x30] sm:$0xff]   ;;  %s597_s19 = smov [#allocation10]  }
  0x35   :  { %416 = vmatprep.subr.bf16.mxu1 %v595_v0  ;;  %432 = vmatprep.mubr.msk.bf16.mxu1 %vm596_vm0, %v595_v0  ;;  %v84_v2 = vsel %vm82_vm1, %v77_v1, 0  ;;  %v465_v3 = vld [vmem:[#allocation7 + $0x38] sm:$0xff]   ;;  %v467_v6 = vld [vmem:[#allocation7 + $0x28] sm:$0xff]   ;;  %v468_v7 = vld [vmem:[#allocation7 + $0x20] sm:$0xff]   ;;  %s360_s20 = sshll.u32 %s597_s19, 4  ;;  %s361_s20 = int_to_ptr.vmem [resolvable:$true] %s360_s20 }
  0x36   :  { %411 = vmatpush3.bf16.msra.mxu0 %v84_v2  ;;  %417 = vmatpush3.bf16.msra.mxu1 %v465_v3  ;;  %v469_v8 = vld [vmem:[#allocation7 + $0x18] sm:$0xff]   ;;  %v470_v9 = vld [vmem:[#allocation7 + $0x10] sm:$0xff]   ;;  %v471_v10 = vld [vmem:[#allocation7 + $0x8] sm:$0xff]   ;;  %p566_p7 = scmp.lt.s32.totalorder %s361_s20, %s361_s20 }
  0x37   :  { %436 = vmatprep.subr.bf16.mxu0 %v595_v0  ;;  %418 = vmatprep.subr.bf16.mxu1 %v595_v0  ;;  %v472_v11 = vld [vmem:[#allocation7] sm:$0xff]   ;;  %v473_v12 = vld [vmem:[#allocation8 + $0x38] sm:$0xff]   ;;  %v474_v13 = vld [vmem:[#allocation8 + $0x30] sm:$0xff]  }
  0x38   :  { %v475_v14 = vld [vmem:[#allocation8 + $0x28] sm:$0xff]   ;;  %v476_v15 = vld [vmem:[#allocation8 + $0x20] sm:$0xff]   ;;  %v477_v16 = vld [vmem:[#allocation8 + $0x18] sm:$0xff]  }
  0x39   :  { %413 = vmatmul.mubr.msk.bf16.vlgmr.msra.gmra.mxu0 %vm78_vm2, %v76_v4  ;;  %v478_v17 = vld [vmem:[#allocation8 + $0x10] sm:$0xff]   ;;  %v479_v24 = vld [vmem:[#allocation8 + $0x8] sm:$0xff]   ;;  %v480_v25 = vld [vmem:[#allocation8] sm:$0xff]  }
  0x3a   :  { %452 = vmatprep.mubr.msk.bf16.mxu0 %vm596_vm0, %v595_v0  ;;  %419 = vmatpush3.bf16.msra.mxu1 %v466_v5  ;;  %v372_v26 = vld [vmem:[%s680_s3] ss:$0 sm:$0xff]  ;;  %s561_s3 = scalar_lea.vmem %s361_s20, 128 }
  0x3b   :  { %420 = vmatprep.subr.bf16.mxu1 %v595_v0  ;;  %437 = vmatpush3.bf16.msra.mxu0 %v473_v12  ;;  %v381_v34 = vld [vmem:[%s682_s5] ss:$0 sm:$0xff]  ;;  %p562_p6 = scmp.ne.s32.totalorder %s361_s20, %s561_s3  ;;  %p567_p8 = scmp.lt.s32.totalorder %s561_s3, %s561_s3 }
  0x3c   :  { %438 = vmatprep.subr.bf16.mxu0 %v595_v0 }
  0x3d   :  { %p568_p9 = por %p567_p8, %p566_p7 }
  0x3e   :  { %421 = vmatpush3.bf16.msra.mxu1 %v467_v6 }
  0x3f   :  { %422 = vmatprep.subr.bf16.mxu1 %v595_v0  ;;  %439 = vmatpush3.bf16.msra.mxu0 %v474_v13  ;;  %p569_p10 = pnand %p568_p9, %p562_p6 }
  0x40   :  { %440 = vmatprep.subr.bf16.mxu0 %v595_v0 }
  0x42   :  { %423 = vmatpush3.bf16.msra.mxu1 %v468_v7 }
  0x43   :  { %424 = vmatprep.subr.bf16.mxu1 %v595_v0  ;;  %441 = vmatpush3.bf16.msra.mxu0 %v475_v14 }
  0x44   :  { %442 = vmatprep.subr.bf16.mxu0 %v595_v0 }
  0x46   :  { %425 = vmatpush3.bf16.msra.mxu1 %v469_v8 }
  0x47   :  { %426 = vmatprep.subr.bf16.mxu1 %v595_v0  ;;  %443 = vmatpush3.bf16.msra.mxu0 %v476_v15 }
  0x48   :  { %444 = vmatprep.subr.bf16.mxu0 %v595_v0 }
  0x4a   :  { %427 = vmatpush3.bf16.msra.mxu1 %v470_v9 }
  0x4b   :  { %428 = vmatprep.subr.bf16.mxu1 %v595_v0  ;;  %445 = vmatpush3.bf16.msra.mxu0 %v477_v16 }
  0x4c   :  { %446 = vmatprep.subr.bf16.mxu0 %v595_v0 }
  0x4e   :  { %429 = vmatpush3.bf16.msra.mxu1 %v471_v10 }
  0x4f   :  { %430 = vmatprep.subr.bf16.mxu1 %v595_v0  ;;  %447 = vmatpush3.bf16.msra.mxu0 %v478_v17 }
  0x50   :  { %448 = vmatprep.subr.bf16.mxu0 %v595_v0 }
  0x52   :  { %431 = vmatpush3.bf16.msra.mxu1 %v472_v11 }
  0x53   :  { %449 = vmatpush3.bf16.msra.mxu0 %v479_v24 }
  0x54   :  { %450 = vmatprep.subr.bf16.mxu0 %v595_v0 }
  0x57   :  { %451 = vmatpush3.bf16.msra.mxu0 %v480_v25 }
  0xf9   :  { %v120_v18 = vpop.f32.mrf.mxu0 }
  0xfa   :  { %v126_v19 = vmax.f32 %v120_v18, 0.0 }
  0xfb   :  { %v414_v20 = vpop.f32.mrf.mxu0 }
  0xfc   :  { %v127_v21 = vpack.c.bf16 %v126_v19, %v126_v19 }
  0xfd   :  { %v123_v22 = vpop.f32.mrf.mxu0 }
  0xfe   :  { %433 = vmatmul.mubr.bf16.vlgmr.msra.gmra.mxu1 %v127_v21 }
  0xff   :  { %v415_v23 = vpop.f32.mrf.mxu0 }
 0x1be   :  { %v233_v27 = vpop.f32.mrf.mxu1 }
 0x1bf   :  { %v234_v28 = vadd.f32 %v372_v26, %v233_v27 }
 0x1c0   :  { %v434_v29 = vpop.f32.mrf.mxu1 }
 0x1c1   :  { %v239_v30 = vmax.f32 %v234_v28, 0.0 }
 0x1c2   :  { %v236_v31 = vpop.f32.mrf.mxu1 }
 0x1c3   :  { %v240_v32 = vpack.c.bf16 %v239_v30, %v239_v30 }
 0x1c4   :  { %v435_v33 = vpop.f32.mrf.mxu1 }
 0x1c5   :  { %453 = vmatmul.mubr.bf16.vlgmr.msra.gmra.mxu0 %v240_v32 }
 0x285   :  { %v346_v35 = vpop.f32.mrf.mxu0 }
 0x286   :  { %v347_v36 = vadd.f32 %v381_v34, %v346_v35 }
 0x287   :  { %v454_v37 = vpop.f32.mrf.mxu0 }
 0x288   :  { %v352_v38 = vmax.f32 %v347_v36, 0.0 }
 0x289   :  { %v349_v39 = vpop.f32.mrf.mxu0 }
 0x28a   :  { %353 = vst [vmem:[#allocation10] sm:$0xff] %v352_v38 }
 0x28b   :  { %v455_v40 = vpop.f32.mrf.mxu0 }
 0x28c   :  { %572 = shalt.err (!%p569_p10)
}
 0x28d   :  { %363 = dma.vmem_to_hbm [thread:$0]  %s361_s20, 128, %s683_s6, [#allocation4]  }
 0x28e   :  { %587 = dma.done.wait [#allocation4], 128  }
 0x28f   :  { %588 = vsyncadd [#allocation4], 4294967168 }
 0x290   :  { %367 = vsyncpa [#allocation3], 1 }
 0x291   :  { %368 = vsyncpa [#allocation6], 1 }
 0x292   :  { %369 = vsyncpa [#allocation9], 1 }
 0x293   :  { %370 = vsyncpa [#allocation4], 1 }

</bundles_post_ra>
